<compile_context>
chip_gen: v7x
topology: tpu7x:2x2x1
jax: 0.10.0
libtpu: 0.0.40
codegen_flags: <defaults>
</compile_context>

<pallas_src>
import functools

import jax
import jax.numpy as jnp
from jax import lax
from jax.experimental import pallas as pl
from jax.experimental.pallas import tpu as pltpu


# 3x3 tap offsets, dh outer / dw inner -- must match weight flattening order.
_TAPS = tuple((dh, dw) for dh in (-1, 0, 1) for dw in (-1, 0, 1))


def _conv_tap_masks(H, W):
    """Validity mask per tap for a 3x3 / pad=1 conv, shape (9, H*W) f32."""
    h = jnp.arange(H, dtype=jnp.int32).reshape(H, 1)
    w = jnp.arange(W, dtype=jnp.int32).reshape(1, W)
    masks = []
    for dh, dw in _TAPS:
        ok = ((h + dh >= 0) & (h + dh < H) & (w + dw >= 0) & (w + dw < W))
        masks.append(ok.reshape(H * W))
    return jnp.stack(masks, axis=0).astype(jnp.float32)


def _residual_kernel(x_ref, mask_ref, w1_ref, w2_ref, s1_ref, b1_ref,
                     s2_ref, b2_ref, *rest, use_1x1conv, W):
    """One batch element per grid step.

    x_ref    : (1, Cin, H*W)   activations, lane axis = flattened spatial
    mask_ref : (9, H*W)        tap validity masks (0/1)
    w1_ref   : (Cout, 9*Cin)   conv1 weights, tap-major / channel-minor
    w2_ref   : (Cout, 9*Cout)  conv2 weights
    s*/b*    : (Cout, 1)       folded conv-bias + BN scale / shift
    w3_ref   : (Cout, Cin)     optional 1x1 projection  (only if use_1x1conv)
    b3_ref   : (Cout, 1)       optional projection bias (only if use_1x1conv)
    o_ref    : (1, Cout, H*W)
    """
    if use_1x1conv:
        w3_ref, b3_ref, o_ref = rest
    else:
        (o_ref,) = rest

    x = x_ref[0]                # (Cin, HW) -- lane-dense
    masks = mask_ref[...]       # (9, HW)

    def im2col(v):
        # v: (C, HW) -> (9*C, HW); rows ordered tap-major / channel-minor to
        # match the flattened weights.  Static lane rolls + boundary masks
        # implement the pad=1 tap gather with no padded scratch buffer.
        taps = []
        for t, (dh, dw) in enumerate(_TAPS):
            shift = dh * W + dw
            r = v if shift == 0 else jnp.roll(v, -shift, axis=-1)
            taps.append(r * masks[t:t + 1, :])
        return jnp.concatenate(taps, axis=0)

    # ---- conv1 (3x3, pad=1, stride=1) + folded BN1 + ReLU ----
    y = jnp.dot(w1_ref[...], im2col(x), preferred_element_type=jnp.float32)
    y = jnp.maximum(y * s1_ref[...] + b1_ref[...], 0.0)        # (Cout, HW)

    # ---- conv2 (3x3, pad=1) + folded BN2 ----
    z = jnp.dot(w2_ref[...], im2col(y), preferred_element_type=jnp.float32)
    z = z * s2_ref[...] + b2_ref[...]

    # ---- skip connection ----
    if use_1x1conv:
        skip = jnp.dot(w3_ref[...], x,
                       preferred_element_type=jnp.float32) + b3_ref[...]
    else:
        skip = x                # identity shortcut (Cin == Cout)

    o_ref[0] = jnp.maximum(z + skip, 0.0).astype(o_ref.dtype)


def residual_forward(x_nchw, params, *, use_1x1conv=False):
    """Pallas forward of the Residual module. x_nchw: (B, Cin, H, W) f32."""
    B, Cin, H, W = x_nchw.shape
    HW = H * W
    w1_hwio = params["w1"].astype(jnp.float32)                 # (3,3,Cin,Cout)
    w2_hwio = params["w2"].astype(jnp.float32)                 # (3,3,Cout,Cout)
    Cout = w1_hwio.shape[-1]
    if not use_1x1conv:
        assert Cin == Cout, "identity shortcut requires in_channels == out_channels"
    eps = 1e-5

    # Fold conv bias + BatchNorm (inference mode) into per-channel scale/shift,
    # laid out (Cout, 1) so the broadcast runs along the lane axis.
    s1 = params["bn1_gamma"] / jnp.sqrt(params["bn1_var"] + eps)
    b1 = params["bn1_beta"] + s1 * (params["b1"] - params["bn1_mean"])
    s2 = params["bn2_gamma"] / jnp.sqrt(params["bn2_var"] + eps)
    b2 = params["bn2_beta"] + s2 * (params["b2"] - params["bn2_mean"])
    s1 = s1.reshape(Cout, 1).astype(jnp.float32)
    b1 = b1.reshape(Cout, 1).astype(jnp.float32)
    s2 = s2.reshape(Cout, 1).astype(jnp.float32)
    b2 = b2.reshape(Cout, 1).astype(jnp.float32)

    # Flatten conv weights for the fused im2col matmul:
    # HWIO (kh,kw,ci,co) -> (co, kh, kw, ci) -> (Cout, 9*Cin), tap-major rows.
    w1f = jnp.transpose(w1_hwio, (3, 0, 1, 2)).reshape(Cout, 9 * Cin)
    w2f = jnp.transpose(w2_hwio, (3, 0, 1, 2)).reshape(Cout, 9 * Cout)

    masks = _conv_tap_masks(H, W)                              # (9, HW)

    # NCHW -> (B, Cin, H*W) is a pure reshape (no transpose, no pad pass).
    x_flat = x_nchw.reshape(B, Cin, HW).astype(jnp.float32)

    inputs = [x_flat, masks, w1f, w2f, s1, b1, s2, b2]
    in_specs = [
        pl.BlockSpec((1, Cin, HW), lambda b: (b, 0, 0)),
        pl.BlockSpec((9, HW), lambda b: (0, 0)),
        pl.BlockSpec((Cout, 9 * Cin), lambda b: (0, 0)),
        pl.BlockSpec((Cout, 9 * Cout), lambda b: (0, 0)),
        pl.BlockSpec((Cout, 1), lambda b: (0, 0)),
        pl.BlockSpec((Cout, 1), lambda b: (0, 0)),
        pl.BlockSpec((Cout, 1), lambda b: (0, 0)),
        pl.BlockSpec((Cout, 1), lambda b: (0, 0)),
    ]
    if use_1x1conv:
        w3 = jnp.transpose(params["w3"], (1, 0)).astype(jnp.float32)  # (Cout,Cin)
        b3 = params["b3"].reshape(Cout, 1).astype(jnp.float32)
        inputs += [w3, b3]
        in_specs += [
            pl.BlockSpec((Cout, Cin), lambda b: (0, 0)),
            pl.BlockSpec((Cout, 1), lambda b: (0, 0)),
        ]

    kernel = functools.partial(_residual_kernel, use_1x1conv=use_1x1conv, W=W)

    out_flat = pl.pallas_call(
        kernel,
        out_shape=jax.ShapeDtypeStruct((B, Cout, HW), jnp.float32),
        grid_spec=pltpu.PrefetchScalarGridSpec(
            num_scalar_prefetch=0,
            grid=(B,),
            in_specs=in_specs,
            out_specs=pl.BlockSpec((1, Cout, HW), lambda b: (b, 0, 0)),
        ),
        compiler_params=pltpu.CompilerParams(
            dimension_semantics=("parallel",)),
    )(*inputs)

    # (B, Cout, H*W) -> NCHW is again a free reshape.
    return out_flat.reshape(B, Cout, H, W)


# ---------------- pure-JAX reference (mirrors the PyTorch forward) ----------
def residual_reference(x_nchw, params, *, use_1x1conv=False):
    eps = 1e-5

    def conv3x3(x, w_hwio, b):
        w_oihw = jnp.transpose(w_hwio, (3, 2, 0, 1))
        y = lax.conv_general_dilated(
            x, w_oihw, window_strides=(1, 1), padding=((1, 1), (1, 1)),
            dimension_numbers=("NCHW", "OIHW", "NCHW"))
        return y + b[None, :, None, None]

    def bn(x, g, be, m, v):
        return (g[None, :, None, None] * (x - m[None, :, None, None])
                / jnp.sqrt(v[None, :, None, None] + eps)
                + be[None, :, None, None])

    Y = jax.nn.relu(bn(conv3x3(x_nchw, params["w1"], params["b1"]),
                       params["bn1_gamma"], params["bn1_beta"],
                       params["bn1_mean"], params["bn1_var"]))
    Y = bn(conv3x3(Y, params["w2"], params["b2"]),
           params["bn2_gamma"], params["bn2_beta"],
           params["bn2_mean"], params["bn2_var"])
    X = x_nchw
    if use_1x1conv:
        X = (jnp.einsum("nchw,co->nohw", x_nchw, params["w3"])
             + params["b3"][None, :, None, None])
    return jax.nn.relu(Y + X)


def make_params(key, cin, cout, use_1x1conv):
    ks = jax.random.split(key, 12)
    p = {
        "w1": 0.1 * jax.random.normal(ks[0], (3, 3, cin, cout), jnp.float32),
        "b1": 0.1 * jax.random.normal(ks[1], (cout,), jnp.float32),
        "w2": 0.1 * jax.random.normal(ks[2], (3, 3, cout, cout), jnp.float32),
        "b2": 0.1 * jax.random.normal(ks[3], (cout,), jnp.float32),
        "bn1_gamma": 1.0 + 0.1 * jax.random.normal(ks[4], (cout,), jnp.float32),
        "bn1_beta": 0.1 * jax.random.normal(ks[5], (cout,), jnp.float32),
        "bn1_mean": 0.1 * jax.random.normal(ks[6], (cout,), jnp.float32),
        "bn1_var": jnp.abs(jax.random.normal(ks[7], (cout,), jnp.float32)) + 0.5,
        "bn2_gamma": 1.0 + 0.1 * jax.random.normal(ks[8], (cout,), jnp.float32),
        "bn2_beta": 0.1 * jax.random.normal(ks[9], (cout,), jnp.float32),
        "bn2_mean": 0.1 * jax.random.normal(ks[10], (cout,), jnp.float32),
        "bn2_var": jnp.abs(jax.random.normal(ks[11], (cout,), jnp.float32)) + 0.5,
    }
    if use_1x1conv:
        k3a, k3b = jax.random.split(jax.random.fold_in(key, 99))
        p["w3"] = 0.1 * jax.random.normal(k3a, (cin, cout), jnp.float32)
        p["b3"] = 0.1 * jax.random.normal(k3b, (cout,), jnp.float32)
    return p


if __name__ == "__main__":
    key = jax.random.PRNGKey(0)

    # Case 1: default Residual(4, 4) — identity shortcut, stride=1.
    B, Cin, Cout, H, W = 2, 4, 4, 16, 16
    kx, kp = jax.random.split(key)
    x = jax.random.normal(kx, (B, Cin, H, W), jnp.float32)
    params = make_params(kp, Cin, Cout, use_1x1conv=False)

    out = jax.block_until_ready(residual_forward(x, params, use_1x1conv=False))
    ref = residual_reference(x, params, use_1x1conv=False)
    assert out.shape == (B, Cout, H, W)
    assert jnp.allclose(out, ref, rtol=1e-4, atol=1e-4)

    # Case 2: Residual(4, 8, use_1x1conv=True) (stride=1) — 1x1 projection shortcut.
    Cout2 = 8
    kp2 = jax.random.fold_in(key, 1)
    params2 = make_params(kp2, Cin, Cout2, use_1x1conv=True)
    out2 = jax.block_until_ready(residual_forward(x, params2, use_1x1conv=True))
    ref2 = residual_reference(x, params2, use_1x1conv=True)
    assert out2.shape == (B, Cout2, H, W)
    assert jnp.allclose(out2, ref2, rtol=1e-4, atol=1e-4)

    print("KERNEL_OK")
</pallas_src>

<mosaic_0001>
module attributes {stable_mosaic.version = 11 : i64} {
  func.func @_residual_kernel(%arg0: i32, %arg1: memref<1x4x256xf32, #tpu.memory_space<vmem>>, %arg2: memref<9x256xf32, #tpu.memory_space<vmem>>, %arg3: memref<4x36xf32, #tpu.memory_space<vmem>>, %arg4: memref<4x36xf32, #tpu.memory_space<vmem>>, %arg5: memref<4x1xf32, #tpu.memory_space<vmem>>, %arg6: memref<4x1xf32, #tpu.memory_space<vmem>>, %arg7: memref<4x1xf32, #tpu.memory_space<vmem>>, %arg8: memref<4x1xf32, #tpu.memory_space<vmem>>, %arg9: memref<1x4x256xf32, #tpu.memory_space<vmem>>) attributes {dimension_semantics = [#tpu.dimension_semantics<parallel>], iteration_bounds = array<i64: 2>, scalar_prefetch = 0 : i64, scratch_operands = 0 : i64, tpu.core_type = #tpu.core_type<tc>, window_params = [{transform_indices = @transform_0, window_bounds = array<i64: 1, 4, 256>}, {pipeline_mode = #tpu.pipeline_mode<synchronous>, transform_indices = @transform_1, window_bounds = array<i64: 9, 256>}, {pipeline_mode = #tpu.pipeline_mode<synchronous>, transform_indices = @transform_2, window_bounds = array<i64: 4, 36>}, {pipeline_mode = #tpu.pipeline_mode<synchronous>, transform_indices = @transform_3, window_bounds = array<i64: 4, 36>}, {pipeline_mode = #tpu.pipeline_mode<synchronous>, transform_indices = @transform_4, window_bounds = array<i64: 4, 1>}, {pipeline_mode = #tpu.pipeline_mode<synchronous>, transform_indices = @transform_5, window_bounds = array<i64: 4, 1>}, {pipeline_mode = #tpu.pipeline_mode<synchronous>, transform_indices = @transform_6, window_bounds = array<i64: 4, 1>}, {pipeline_mode = #tpu.pipeline_mode<synchronous>, transform_indices = @transform_7, window_bounds = array<i64: 4, 1>}, {transform_indices = @transform_8, window_bounds = array<i64: 1, 4, 256>}]} {
    %c0 = arith.constant 0 : index
    %c0_0 = arith.constant 0 : index
    %c0_1 = arith.constant 0 : index
    %0 = vector.load %arg1[%c0, %c0_0, %c0_1] : memref<1x4x256xf32, #tpu.memory_space<vmem>>, vector<1x4x256xf32>
    %1 = vector.shape_cast %0 : vector<1x4x256xf32> to vector<4x256xf32>
    %c0_2 = arith.constant 0 : index
    %c0_3 = arith.constant 0 : index
    %2 = vector.load %arg2[%c0_2, %c0_3] : memref<9x256xf32, #tpu.memory_space<vmem>>, vector<9x256xf32>
    %c0_4 = arith.constant 0 : index
    %c0_5 = arith.constant 0 : index
    %3 = vector.load %arg3[%c0_4, %c0_5] : memref<4x36xf32, #tpu.memory_space<vmem>>, vector<4x36xf32>
    %4 = vector.extract_strided_slice %1 {offsets = [0, 239], sizes = [4, 17], strides = [1, 1]} : vector<4x256xf32> to vector<4x17xf32>
    %5 = vector.extract_strided_slice %1 {offsets = [0, 0], sizes = [4, 239], strides = [1, 1]} : vector<4x256xf32> to vector<4x239xf32>
    %6 = tpu.concatenate %4, %5 in 1 : vector<4x17xf32>, vector<4x239xf32> -> vector<4x256xf32>
    %7 = vector.extract_strided_slice %2 {offsets = [0, 0], sizes = [1, 256], strides = [1, 1]} : vector<9x256xf32> to vector<1x256xf32>
    %8 = vector.broadcast %7 : vector<1x256xf32> to vector<4x256xf32>
    %9 = arith.mulf %6, %8 : vector<4x256xf32>
    %10 = vector.extract_strided_slice %1 {offsets = [0, 240], sizes = [4, 16], strides = [1, 1]} : vector<4x256xf32> to vector<4x16xf32>
    %11 = vector.extract_strided_slice %1 {offsets = [0, 0], sizes = [4, 240], strides = [1, 1]} : vector<4x256xf32> to vector<4x240xf32>
    %12 = tpu.concatenate %10, %11 in 1 : vector<4x16xf32>, vector<4x240xf32> -> vector<4x256xf32>
    %13 = vector.extract_strided_slice %2 {offsets = [1, 0], sizes = [1, 256], strides = [1, 1]} : vector<9x256xf32> to vector<1x256xf32>
    %14 = vector.broadcast %13 : vector<1x256xf32> to vector<4x256xf32>
    %15 = arith.mulf %12, %14 : vector<4x256xf32>
    %16 = vector.extract_strided_slice %1 {offsets = [0, 241], sizes = [4, 15], strides = [1, 1]} : vector<4x256xf32> to vector<4x15xf32>
    %17 = vector.extract_strided_slice %1 {offsets = [0, 0], sizes = [4, 241], strides = [1, 1]} : vector<4x256xf32> to vector<4x241xf32>
    %18 = tpu.concatenate %16, %17 in 1 : vector<4x15xf32>, vector<4x241xf32> -> vector<4x256xf32>
    %19 = vector.extract_strided_slice %2 {offsets = [2, 0], sizes = [1, 256], strides = [1, 1]} : vector<9x256xf32> to vector<1x256xf32>
    %20 = vector.broadcast %19 : vector<1x256xf32> to vector<4x256xf32>
    %21 = arith.mulf %18, %20 : vector<4x256xf32>
    %22 = vector.extract_strided_slice %1 {offsets = [0, 255], sizes = [4, 1], strides = [1, 1]} : vector<4x256xf32> to vector<4x1xf32>
    %23 = vector.extract_strided_slice %1 {offsets = [0, 0], sizes = [4, 255], strides = [1, 1]} : vector<4x256xf32> to vector<4x255xf32>
    %24 = tpu.concatenate %22, %23 in 1 : vector<4x1xf32>, vector<4x255xf32> -> vector<4x256xf32>
    %25 = vector.extract_strided_slice %2 {offsets = [3, 0], sizes = [1, 256], strides = [1, 1]} : vector<9x256xf32> to vector<1x256xf32>
    %26 = vector.broadcast %25 : vector<1x256xf32> to vector<4x256xf32>
    %27 = arith.mulf %24, %26 : vector<4x256xf32>
    %28 = vector.extract_strided_slice %2 {offsets = [4, 0], sizes = [1, 256], strides = [1, 1]} : vector<9x256xf32> to vector<1x256xf32>
    %29 = vector.broadcast %28 : vector<1x256xf32> to vector<4x256xf32>
    %30 = arith.mulf %1, %29 : vector<4x256xf32>
    %31 = vector.extract_strided_slice %1 {offsets = [0, 1], sizes = [4, 255], strides = [1, 1]} : vector<4x256xf32> to vector<4x255xf32>
    %32 = vector.extract_strided_slice %1 {offsets = [0, 0], sizes = [4, 1], strides = [1, 1]} : vector<4x256xf32> to vector<4x1xf32>
    %33 = tpu.concatenate %31, %32 in 1 : vector<4x255xf32>, vector<4x1xf32> -> vector<4x256xf32>
    %34 = vector.extract_strided_slice %2 {offsets = [5, 0], sizes = [1, 256], strides = [1, 1]} : vector<9x256xf32> to vector<1x256xf32>
    %35 = vector.broadcast %34 : vector<1x256xf32> to vector<4x256xf32>
    %36 = arith.mulf %33, %35 : vector<4x256xf32>
    %37 = vector.extract_strided_slice %1 {offsets = [0, 15], sizes = [4, 241], strides = [1, 1]} : vector<4x256xf32> to vector<4x241xf32>
    %38 = vector.extract_strided_slice %1 {offsets = [0, 0], sizes = [4, 15], strides = [1, 1]} : vector<4x256xf32> to vector<4x15xf32>
    %39 = tpu.concatenate %37, %38 in 1 : vector<4x241xf32>, vector<4x15xf32> -> vector<4x256xf32>
    %40 = vector.extract_strided_slice %2 {offsets = [6, 0], sizes = [1, 256], strides = [1, 1]} : vector<9x256xf32> to vector<1x256xf32>
    %41 = vector.broadcast %40 : vector<1x256xf32> to vector<4x256xf32>
    %42 = arith.mulf %39, %41 : vector<4x256xf32>
    %43 = vector.extract_strided_slice %1 {offsets = [0, 16], sizes = [4, 240], strides = [1, 1]} : vector<4x256xf32> to vector<4x240xf32>
    %44 = vector.extract_strided_slice %1 {offsets = [0, 0], sizes = [4, 16], strides = [1, 1]} : vector<4x256xf32> to vector<4x16xf32>
    %45 = tpu.concatenate %43, %44 in 1 : vector<4x240xf32>, vector<4x16xf32> -> vector<4x256xf32>
    %46 = vector.extract_strided_slice %2 {offsets = [7, 0], sizes = [1, 256], strides = [1, 1]} : vector<9x256xf32> to vector<1x256xf32>
    %47 = vector.broadcast %46 : vector<1x256xf32> to vector<4x256xf32>
    %48 = arith.mulf %45, %47 : vector<4x256xf32>
    %49 = vector.extract_strided_slice %1 {offsets = [0, 17], sizes = [4, 239], strides = [1, 1]} : vector<4x256xf32> to vector<4x239xf32>
    %50 = vector.extract_strided_slice %1 {offsets = [0, 0], sizes = [4, 17], strides = [1, 1]} : vector<4x256xf32> to vector<4x17xf32>
    %51 = tpu.concatenate %49, %50 in 1 : vector<4x239xf32>, vector<4x17xf32> -> vector<4x256xf32>
    %52 = vector.extract_strided_slice %2 {offsets = [8, 0], sizes = [1, 256], strides = [1, 1]} : vector<9x256xf32> to vector<1x256xf32>
    %53 = vector.broadcast %52 : vector<1x256xf32> to vector<4x256xf32>
    %54 = arith.mulf %51, %53 : vector<4x256xf32>
    %55 = tpu.concatenate %9, %15, %21, %27, %30, %36, %42, %48, %54 in 0 : vector<4x256xf32>, vector<4x256xf32>, vector<4x256xf32>, vector<4x256xf32>, vector<4x256xf32>, vector<4x256xf32>, vector<4x256xf32>, vector<4x256xf32>, vector<4x256xf32> -> vector<36x256xf32>
    %cst = arith.constant dense<0.000000e+00> : vector<4x256xf32>
    %56 = tpu.matmul %3, %55, %cst {dimension_numbers = #tpu.dot_dimension_numbers<[1], [0], [0], [1], [0, 0, 1, 1], [], []>} : vector<4x36xf32>, vector<36x256xf32>, vector<4x256xf32> -> vector<4x256xf32>
    %c0_6 = arith.constant 0 : index
    %c0_7 = arith.constant 0 : index
    %57 = vector.load %arg5[%c0_6, %c0_7] : memref<4x1xf32, #tpu.memory_space<vmem>>, vector<4x1xf32>
    %58 = vector.broadcast %57 : vector<4x1xf32> to vector<4x256xf32>
    %59 = arith.mulf %56, %58 : vector<4x256xf32>
    %c0_8 = arith.constant 0 : index
    %c0_9 = arith.constant 0 : index
    %60 = vector.load %arg6[%c0_8, %c0_9] : memref<4x1xf32, #tpu.memory_space<vmem>>, vector<4x1xf32>
    %61 = vector.broadcast %60 : vector<4x1xf32> to vector<4x256xf32>
    %62 = arith.addf %59, %61 : vector<4x256xf32>
    %cst_10 = arith.constant 0.000000e+00 : f32
    %63 = vector.broadcast %cst_10 : f32 to vector<4x256xf32>
    %64 = arith.maximumf %62, %63 : vector<4x256xf32>
    %c0_11 = arith.constant 0 : index
    %c0_12 = arith.constant 0 : index
    %65 = vector.load %arg4[%c0_11, %c0_12] : memref<4x36xf32, #tpu.memory_space<vmem>>, vector<4x36xf32>
    %66 = vector.extract_strided_slice %64 {offsets = [0, 239], sizes = [4, 17], strides = [1, 1]} : vector<4x256xf32> to vector<4x17xf32>
    %67 = vector.extract_strided_slice %64 {offsets = [0, 0], sizes = [4, 239], strides = [1, 1]} : vector<4x256xf32> to vector<4x239xf32>
    %68 = tpu.concatenate %66, %67 in 1 : vector<4x17xf32>, vector<4x239xf32> -> vector<4x256xf32>
    %69 = vector.extract_strided_slice %2 {offsets = [0, 0], sizes = [1, 256], strides = [1, 1]} : vector<9x256xf32> to vector<1x256xf32>
    %70 = vector.broadcast %69 : vector<1x256xf32> to vector<4x256xf32>
    %71 = arith.mulf %68, %70 : vector<4x256xf32>
    %72 = vector.extract_strided_slice %64 {offsets = [0, 240], sizes = [4, 16], strides = [1, 1]} : vector<4x256xf32> to vector<4x16xf32>
    %73 = vector.extract_strided_slice %64 {offsets = [0, 0], sizes = [4, 240], strides = [1, 1]} : vector<4x256xf32> to vector<4x240xf32>
    %74 = tpu.concatenate %72, %73 in 1 : vector<4x16xf32>, vector<4x240xf32> -> vector<4x256xf32>
    %75 = vector.extract_strided_slice %2 {offsets = [1, 0], sizes = [1, 256], strides = [1, 1]} : vector<9x256xf32> to vector<1x256xf32>
    %76 = vector.broadcast %75 : vector<1x256xf32> to vector<4x256xf32>
    %77 = arith.mulf %74, %76 : vector<4x256xf32>
    %78 = vector.extract_strided_slice %64 {offsets = [0, 241], sizes = [4, 15], strides = [1, 1]} : vector<4x256xf32> to vector<4x15xf32>
    %79 = vector.extract_strided_slice %64 {offsets = [0, 0], sizes = [4, 241], strides = [1, 1]} : vector<4x256xf32> to vector<4x241xf32>
    %80 = tpu.concatenate %78, %79 in 1 : vector<4x15xf32>, vector<4x241xf32> -> vector<4x256xf32>
    %81 = vector.extract_strided_slice %2 {offsets = [2, 0], sizes = [1, 256], strides = [1, 1]} : vector<9x256xf32> to vector<1x256xf32>
    %82 = vector.broadcast %81 : vector<1x256xf32> to vector<4x256xf32>
    %83 = arith.mulf %80, %82 : vector<4x256xf32>
    %84 = vector.extract_strided_slice %64 {offsets = [0, 255], sizes = [4, 1], strides = [1, 1]} : vector<4x256xf32> to vector<4x1xf32>
    %85 = vector.extract_strided_slice %64 {offsets = [0, 0], sizes = [4, 255], strides = [1, 1]} : vector<4x256xf32> to vector<4x255xf32>
    %86 = tpu.concatenate %84, %85 in 1 : vector<4x1xf32>, vector<4x255xf32> -> vector<4x256xf32>
    %87 = vector.extract_strided_slice %2 {offsets = [3, 0], sizes = [1, 256], strides = [1, 1]} : vector<9x256xf32> to vector<1x256xf32>
    %88 = vector.broadcast %87 : vector<1x256xf32> to vector<4x256xf32>
    %89 = arith.mulf %86, %88 : vector<4x256xf32>
    %90 = vector.extract_strided_slice %2 {offsets = [4, 0], sizes = [1, 256], strides = [1, 1]} : vector<9x256xf32> to vector<1x256xf32>
    %91 = vector.broadcast %90 : vector<1x256xf32> to vector<4x256xf32>
    %92 = arith.mulf %64, %91 : vector<4x256xf32>
    %93 = vector.extract_strided_slice %64 {offsets = [0, 1], sizes = [4, 255], strides = [1, 1]} : vector<4x256xf32> to vector<4x255xf32>
    %94 = vector.extract_strided_slice %64 {offsets = [0, 0], sizes = [4, 1], strides = [1, 1]} : vector<4x256xf32> to vector<4x1xf32>
    %95 = tpu.concatenate %93, %94 in 1 : vector<4x255xf32>, vector<4x1xf32> -> vector<4x256xf32>
    %96 = vector.extract_strided_slice %2 {offsets = [5, 0], sizes = [1, 256], strides = [1, 1]} : vector<9x256xf32> to vector<1x256xf32>
    %97 = vector.broadcast %96 : vector<1x256xf32> to vector<4x256xf32>
    %98 = arith.mulf %95, %97 : vector<4x256xf32>
    %99 = vector.extract_strided_slice %64 {offsets = [0, 15], sizes = [4, 241], strides = [1, 1]} : vector<4x256xf32> to vector<4x241xf32>
    %100 = vector.extract_strided_slice %64 {offsets = [0, 0], sizes = [4, 15], strides = [1, 1]} : vector<4x256xf32> to vector<4x15xf32>
    %101 = tpu.concatenate %99, %100 in 1 : vector<4x241xf32>, vector<4x15xf32> -> vector<4x256xf32>
    %102 = vector.extract_strided_slice %2 {offsets = [6, 0], sizes = [1, 256], strides = [1, 1]} : vector<9x256xf32> to vector<1x256xf32>
    %103 = vector.broadcast %102 : vector<1x256xf32> to vector<4x256xf32>
    %104 = arith.mulf %101, %103 : vector<4x256xf32>
    %105 = vector.extract_strided_slice %64 {offsets = [0, 16], sizes = [4, 240], strides = [1, 1]} : vector<4x256xf32> to vector<4x240xf32>
    %106 = vector.extract_strided_slice %64 {offsets = [0, 0], sizes = [4, 16], strides = [1, 1]} : vector<4x256xf32> to vector<4x16xf32>
    %107 = tpu.concatenate %105, %106 in 1 : vector<4x240xf32>, vector<4x16xf32> -> vector<4x256xf32>
    %108 = vector.extract_strided_slice %2 {offsets = [7, 0], sizes = [1, 256], strides = [1, 1]} : vector<9x256xf32> to vector<1x256xf32>
    %109 = vector.broadcast %108 : vector<1x256xf32> to vector<4x256xf32>
    %110 = arith.mulf %107, %109 : vector<4x256xf32>
    %111 = vector.extract_strided_slice %64 {offsets = [0, 17], sizes = [4, 239], strides = [1, 1]} : vector<4x256xf32> to vector<4x239xf32>
    %112 = vector.extract_strided_slice %64 {offsets = [0, 0], sizes = [4, 17], strides = [1, 1]} : vector<4x256xf32> to vector<4x17xf32>
    %113 = tpu.concatenate %111, %112 in 1 : vector<4x239xf32>, vector<4x17xf32> -> vector<4x256xf32>
    %114 = vector.extract_strided_slice %2 {offsets = [8, 0], sizes = [1, 256], strides = [1, 1]} : vector<9x256xf32> to vector<1x256xf32>
    %115 = vector.broadcast %114 : vector<1x256xf32> to vector<4x256xf32>
    %116 = arith.mulf %113, %115 : vector<4x256xf32>
    %117 = tpu.concatenate %71, %77, %83, %89, %92, %98, %104, %110, %116 in 0 : vector<4x256xf32>, vector<4x256xf32>, vector<4x256xf32>, vector<4x256xf32>, vector<4x256xf32>, vector<4x256xf32>, vector<4x256xf32>, vector<4x256xf32>, vector<4x256xf32> -> vector<36x256xf32>
    %cst_13 = arith.constant dense<0.000000e+00> : vector<4x256xf32>
    %118 = tpu.matmul %65, %117, %cst_13 {dimension_numbers = #tpu.dot_dimension_numbers<[1], [0], [0], [1], [0, 0, 1, 1], [], []>} : vector<4x36xf32>, vector<36x256xf32>, vector<4x256xf32> -> vector<4x256xf32>
    %c0_14 = arith.constant 0 : index
    %c0_15 = arith.constant 0 : index
    %119 = vector.load %arg7[%c0_14, %c0_15] : memref<4x1xf32, #tpu.memory_space<vmem>>, vector<4x1xf32>
    %120 = vector.broadcast %119 : vector<4x1xf32> to vector<4x256xf32>
    %121 = arith.mulf %118, %120 : vector<4x256xf32>
    %c0_16 = arith.constant 0 : index
    %c0_17 = arith.constant 0 : index
    %122 = vector.load %arg8[%c0_16, %c0_17] : memref<4x1xf32, #tpu.memory_space<vmem>>, vector<4x1xf32>
    %123 = vector.broadcast %122 : vector<4x1xf32> to vector<4x256xf32>
    %124 = arith.addf %121, %123 : vector<4x256xf32>
    %125 = arith.addf %124, %1 : vector<4x256xf32>
    %cst_18 = arith.constant 0.000000e+00 : f32
    %126 = vector.broadcast %cst_18 : f32 to vector<4x256xf32>
    %127 = arith.maximumf %125, %126 : vector<4x256xf32>
    %c0_19 = arith.constant 0 : index
    %c0_20 = arith.constant 0 : index
    %c0_21 = arith.constant 0 : index
    %128 = vector.load %arg9[%c0_19, %c0_20, %c0_21] : memref<1x4x256xf32, #tpu.memory_space<vmem>>, vector<1x4x256xf32>
    %129 = vector.shape_cast %128 : vector<1x4x256xf32> to vector<4x256xf32>
    %130 = vector.shape_cast %127 : vector<4x256xf32> to vector<1x4x256xf32>
    tpu.vector_store %arg9[%c0_19, %c0_20, %c0_21], %130 {strides = array<i32>} : memref<1x4x256xf32, #tpu.memory_space<vmem>>, vector<1x4x256xf32>,
    return
  }
  func.func @transform_0(%arg0: i32) -> (i32, i32, i32) {
    %c0_i32 = arith.constant 0 : i32
    %c0_i32_0 = arith.constant 0 : i32
    %c0_i32_1 = arith.constant 0 : i32
    return %arg0, %c0_i32, %c0_i32_0 : i32, i32, i32
  }
  func.func @transform_1(%arg0: i32) -> (i32, i32) {
    %c0_i32 = arith.constant 0 : i32
    %c0_i32_0 = arith.constant 0 : i32
    %c0_i32_1 = arith.constant 0 : i32
    return %c0_i32, %c0_i32_0 : i32, i32
  }
  func.func @transform_2(%arg0: i32) -> (i32, i32) {
    %c0_i32 = arith.constant 0 : i32
    %c0_i32_0 = arith.constant 0 : i32
    %c0_i32_1 = arith.constant 0 : i32
    return %c0_i32, %c0_i32_0 : i32, i32
  }
  func.func @transform_3(%arg0: i32) -> (i32, i32) {
    %c0_i32 = arith.constant 0 : i32
    %c0_i32_0 = arith.constant 0 : i32
    %c0_i32_1 = arith.constant 0 : i32
    return %c0_i32, %c0_i32_0 : i32, i32
  }
  func.func @transform_4(%arg0: i32) -> (i32, i32) {
    %c0_i32 = arith.constant 0 : i32
    %c0_i32_0 = arith.constant 0 : i32
    %c0_i32_1 = arith.constant 0 : i32
    return %c0_i32, %c0_i32_0 : i32, i32
  }
  func.func @transform_5(%arg0: i32) -> (i32, i32) {
    %c0_i32 = arith.constant 0 : i32
    %c0_i32_0 = arith.constant 0 : i32
    %c0_i32_1 = arith.constant 0 : i32
    return %c0_i32, %c0_i32_0 : i32, i32
  }
  func.func @transform_6(%arg0: i32) -> (i32, i32) {
    %c0_i32 = arith.constant 0 : i32
    %c0_i32_0 = arith.constant 0 : i32
    %c0_i32_1 = arith.constant 0 : i32
    return %c0_i32, %c0_i32_0 : i32, i32
  }
  func.func @transform_7(%arg0: i32) -> (i32, i32) {
    %c0_i32 = arith.constant 0 : i32
    %c0_i32_0 = arith.constant 0 : i32
    %c0_i32_1 = arith.constant 0 : i32
    return %c0_i32, %c0_i32_0 : i32, i32
  }
  func.func @transform_8(%arg0: i32) -> (i32, i32, i32) {
    %c0_i32 = arith.constant 0 : i32
    %c0_i32_0 = arith.constant 0 : i32
    %c0_i32_1 = arith.constant 0 : i32
    return %arg0, %c0_i32, %c0_i32_0 : i32, i32, i32
  }
}

</mosaic_0001>

<bundles_post_ra>
// kernel: tpu_custom_call.1
= control target key start
LH: loop header
LB: loop body
LE: loop exit
PB: predicated region body
PF: predicated region fallthrough
CT: control target
= control target key end

     0   :  { %13 = vsyncpa [#allocation3], 0  ;;  %s1589_s0 = inlined_call_operand.vmem [shape: f32[2,4,256], index: 0, kind: input, shape index: {}]   ;;  %s1590_s1 = inlined_call_operand.hbm [shape: f32[9,256], index: 1, kind: input, shape index: {}]   ;;  %s1591_s2 = inlined_call_operand.vmem [shape: f32[4,36], index: 2, kind: input, shape index: {}]   ;;  %s1592_s3 = inlined_call_operand.vmem [shape: f32[4,36], index: 3, kind: input, shape index: {}]   ;;  %s1593_s4 = inlined_call_operand.vmem [shape: f32[4,1], index: 4, kind: input, shape index: {}]   ;;  %s1594_s5 = inlined_call_operand.vmem [shape: f32[4,1], index: 5, kind: input, shape index: {}]   ;;  %s1595_s6 = inlined_call_operand.vmem [shape: f32[4,1], index: 6, kind: input, shape index: {}]   ;;  %s1596_s7 = inlined_call_operand.vmem [shape: f32[4,1], index: 7, kind: input, shape index: {}]   ;;  %s1597_s8 = inlined_call_operand.hbm [shape: f32[2,4,256], index: 8, kind: output, shape index: {}]  }
   0x1   :  { %14 = vsyncpa [#allocation4], 0 }
   0x2   :  { %16 = vsyncpa [#allocation4 + $0x1], 0  ;;  %s1212_s27 = smov 0   ;;  %s1214_s28 = smov 0  }
   0x3   :  { %s1216_s29 = smov 0   ;;  %s1218_s30 = smov 0  }
   0x4 LB: > { %s1233_s9 = sadd.s32 4294967295, %s1151_s30   ;;  %s952_s10 = sadd.s32 4294967294, %s1151_s30   ;;  %s1151_s30 = sphi %s1218_s30, %s1613_s30   ;;  %s1147_s29 = sphi %s1216_s29, %s1612_s29   ;;  %s1143_s28 = sphi %s1214_s28, %s1611_s28   ;;  %s1139_s27 = sphi %s1212_s27, %s1610_s27  }
   0x5   : > { %s1237_s11 = sadd.s32 1, %s1151_s30   ;;  %s202_s12 = sadd.s32 1, %s1147_s29 }
   0x6   : > { %s199_s13 = ssub.s32 %s1151_s30, %s1237_s11  ;;  %p212_p0 = scmp.ne.s32.totalorder %s1147_s29, %s1143_s28 }
   0x7   : > { %p200_p1 = scmp.eq.s32.totalorder %s199_s13, 0  ;;  %p213_p2 = scmp.eq.s32.totalorder %s1233_s9, 1 }
   0x8   : > { %p218_p3 = scmp.ne.s32.totalorder %s1143_s28, %s1139_s27  ;;  %p219_p4 = scmp.eq.s32.totalorder %s952_s10, 1 }
   0x9   : > { %s1248_s14 = scalar_select %p200_p1, %s1147_s29, %s202_s12  }
   0xa   : > { %p1250_p5 = por %p213_p2, %p212_p0  ;;  %p1254_p6 = por %p219_p4, %p218_p3 }
   0xb   : > { %p953_p7 = scmp.ge.s32.totalorder %s1151_s30, 1  ;;  %p226_p8 = scmp.lt.s32.totalorder %s1151_s30, 3 }
   0xc   : > { %s1601_s15 = scalar_select %p1250_p5, 1, 0 }
   0xd   : > { %s1602_s16 = scalar_select %p1254_p6, 1, 0 }
   0xe   : > { %p1598_p9 = scmp.eq.s32.totalorder %s1233_s9, 0  ;;  %p1261_p10 = pnand %p953_p7, %p226_p8 }
   0xf   : > { %s1153_s18 = smov [#allocation2]   ;;  %s1057_s23 = scalar_lea.hbm %s1590_s1, 512 }
  0x10   : > { %s1603_s17 = scalar_select %p1261_p10, 1, 0 }
  0x11   : > { %s238_s19 = sshll.u32 %s1153_s18, 4  ;;  %p998_p11 = pneg %p1261_p10  ;;  %s239_s19 = int_to_ptr.vmem [resolvable:$true] %s238_s19 }
  0x12   : > { %p1058_p13 = scmp.ne.s32.totalorder %s1590_s1, %s1057_s23  ;;  %p1064_p3 = scmp.lt.u32.totalorder %s1057_s23, %s1590_s1 }
  0x13   : > { %p1269_p12 = pnand %p1598_p9, %p998_p11 }
  0x15   : > { %p1059_p0 = pneg %p1269_p12 }
  0x17   : > { %p1060_p1 = pnand %p1059_p0, %p1058_p13 }
  0x19   : > { %p1061_p2 = pneg %p1060_p1 }
  0x1b   : > { %p1066_p4 = pnand %p1064_p3, %p1061_p2 }
  0x1d   : > { %1069 = shalt.err (!%p1066_p4)
}
  0x1e   : > { %s1070_s12 = scalar_lea.vmem %s239_s19, 512  ;;  %p1078_p9 = scmp.lt.s32.totalorder %s239_s19, %s239_s19 }
  0x1f   : > { %p1071_p7 = scmp.ne.s32.totalorder %s239_s19, %s1070_s12  ;;  %p1079_p6 = scmp.lt.s32.totalorder %s1070_s12, %s1070_s12 }
  0x21   : > { %p1073_p8 = pnand %p1071_p7, %p1059_p0  ;;  %p1080_p5 = por %p1079_p6, %p1078_p9 }
  0x23   : > { %p1074_p11 = pneg %p1073_p8 }
  0x25   : > { %p1081_p10 = pnand %p1080_p5, %p1074_p11 }
  0x27   : > { %1084 = shalt.err (!%p1081_p10)
}
  0x28   : > { %s1154_s13 = smov 256   ;;  %s1155_s18 = smov 16  }
  0x29   : > { %1001 = dma.hbm_to_vmem [thread:$0]  (!%p1269_p12), %s1590_s1, 512, %s239_s19, [#allocation3], %s1154_s13, %s1154_s13, %s1155_s18  }
  0x2a   : > { %p1605_p13 = scmp.ne.s32.totalorder %s1603_s17, 0 }
  0x2b   : > { %p1606_p1 = scmp.eq.s32.totalorder (!%p1605_p13), %s1233_s9, 0 }
  0x2c   : > { %280 = sbr.rel (%p1605_p13) target bundleno = 816 (0x330), region = 52 }
  0x33   : > { %1130 = dma.done.wait (%p1606_p1), [#allocation3], 512   ;;  %p1607_p0 = pmov %p1606_p1 }
  0x34   : > { %p314_p5 = scmp.lt.s32.totalorder %s1233_s9, 1  ;;  %s1156_s19 = smov 1   ;;  %v1162_v2 = vmov 0.0   ;;  %v1164_v3 = vmov 0   ;;  %v617_v4 = vld [vmem:[%s1593_s4] sm:$0xf]  ;;  %v337_v6 = vlaneseq }
  0x35   : > { %1132 = vsyncadd (%p1607_p0), [#allocation3], 4294966784  ;;  %s1157_s17 = smov 16   ;;  %s1158_s10 = smov 17   ;;  %610 = vmatprep.mubr.f32.mxu0 %v1162_v2  ;;  %833 = vmatprep.mubr.f32.mxu1 %v1162_v2  ;;  %v625_v5 = vld [vmem:[%s1594_s5] sm:$0xf] }
  0x36   : > { %s315_s23 = scalar_select %p314_p5, %s1233_s9, 1  ;;  %1054 = vset.pattern.permute.xlu0 %v1164_v3  ;;  %1055 = vset.pattern.permute.xlu1 %v1164_v3  ;;  %v1344_v7 = vshrl.u32 %v337_v6, 7  ;;  %v1347_v11 = vld [vmem:[#allocation2] sm:$0xff]  ;;  %v1349_v12 = vld [vmem:[#allocation2 + $0x8] sm:$0xff]  ;;  %vm352_vm0 = vcmask 130048   ;;  %vm392_vm1 = vcmask 7168  }
  0x37   : > { %s1159_s12 = smov 15   ;;  %s1160_s13 = smov 127   ;;  %vm332_vm2 = vcmask 138240   ;;  %vm372_vm3 = vcmask 121856   ;;  %vm527_vm4 = vcmask 1043456   ;;  %vm424_vm5 = vcmask 1039360  }
  0x38   : > { %s974_s24 = sshll.u32 %s315_s23, 3  ;;  %s1161_s18 = smov 112   ;;  %v359_v10 = vsub.s32 1, %v1344_v7  ;;  %v399_v13 = vsub.s32 3, %v1344_v7  ;;  %v339_v18 = vsub.s32 0, %v1344_v7  ;;  %v379_v23 = vsub.s32 2, %v1344_v7 }
  0x39   : > { %s318_s26 = scalar_lea.vmem %s1589_s0, %s974_s24  ;;  %s1163_s21 = smov 113   ;;  %v409_v24 = vsub.s32 4, %v1344_v7  ;;  %v432_v39 = vsub.s32 5, %v1344_v7  ;;  %v472_v46 = vsub.s32 7, %v1344_v7  ;;  %vm464_vm6 = vcmask 916480  }
  0x3a   : > { %v1300_v0 = vld [vmem:[%s318_s26] sm:$0xff]  ;;  %s1165_s22 = smov 111   ;;  %v1353_v15 = vrot.slane %v1347_v11, %v359_v10  ;;  %v1356_v16 = vrot.slane %v1349_v12, %v359_v10  ;;  %v1362_v21 = vrot.slane %v1347_v11, %v399_v13  ;;  %v1365_v22 = vrot.slane %v1349_v12, %v399_v13  ;;  %s975_s24 = sshll.u32 %s1233_s9, 7 }
  0x3b   : > { %390 = vrot.lane.b32.xlu1 %v1300_v0, %s1156_s19  ;;  %350 = vrot.lane.b32.xlu0 %v1300_v0, %s1157_s17  ;;  %v1308_v1 = vcombine.high %v1300_v0, %v1300_v0  ;;  %v1372_v28 = vrot.slane %v1347_v11, %v339_v18  ;;  %v1375_v29 = vrot.slane %v1349_v12, %v339_v18  ;;  %vm444_vm7 = vcmask 924672   ;;  %p1608_p9 = scmp.ne.s32.totalorder %s1601_s15, 0  ;;  %s1166_s9 = smov [#allocation5]  }
  0x3c   : > { %v1384_v37 = vrot.slane %v1347_v11, %v379_v23  ;;  %v1387_v38 = vrot.slane %v1349_v12, %v379_v23  ;;  %v1391_v40 = vrot.slane %v1347_v11, %v409_v24  ;;  %v1394_v41 = vrot.slane %v1349_v12, %v409_v24 }
  0x3d   : > { %v1404_v55 = vrot.slane %v1347_v11, %v432_v39  ;;  %v1407_v56 = vrot.slane %v1349_v12, %v432_v39  ;;  %v1418_v6 = vrot.slane %v1347_v11, %v472_v46  ;;  %vm484_vm8 = vcmask 908288  }
  0x3e   : > { %v417_v57 = vcombine.low %v1391_v40, %v1394_v41  ;;  %vm536_vm9 = vcmask 293888  }
  0x3f   : > { %330 = vrot.lane.b32.xlu1 %v1300_v0, %s1158_s10  ;;  %347 = vrot.lane.b32.xlu0 %v1308_v1, %s1157_s17 }
  0x40   : > { %v419_v18 = vmul.f32 %v417_v57, %v1300_v0  ;;  %v324_v57 = vld [vmem:[%s1591_s2] sm:$0xf] }
  0x43   : > { %387 = vrot.lane.b32.xlu1 %v1308_v1, %s1156_s19  ;;  %327 = vrot.lane.b32.xlu0 %v1308_v1, %s1158_s10 }
  0x47   : > { %370 = vrot.lane.b32.xlu1 %v1300_v0, %s1159_s12  ;;  %367 = vrot.lane.b32.xlu0 %v1308_v1, %s1159_s12 }
  0x4b   : > { %422 = vrot.lane.b32.xlu1 %v1308_v1, %s1160_s13  ;;  %420 = vrot.lane.b32.xlu0 %v1300_v0, %s1160_s13 }
  0x4f   : > { %462 = vrot.lane.b32.xlu1 %v1308_v1, %s1161_s18  ;;  %460 = vrot.lane.b32.xlu0 %v1300_v0, %s1161_s18 }
  0x53   : > { %442 = vrot.lane.b32.xlu1 %v1308_v1, %s1163_s21  ;;  %440 = vrot.lane.b32.xlu0 %v1300_v0, %s1163_s21 }
  0x57   : > { %482 = vrot.lane.b32.xlu1 %v1308_v1, %s1165_s22  ;;  %480 = vrot.lane.b32.xlu0 %v1300_v0, %s1165_s22 }
  0x5b   : > { %620 = vperm.xlu0 %1054, %v617_v4   ;;  %628 = vperm.xlu1 %1055, %v625_v5  }
  0xad   : > { %v391_v8 = vpop.permute.xlu1 %390  ;;  %v351_v9 = vpop.permute.xlu0 %350 }
  0xb1   : > { %v331_v14 = vpop.permute.xlu1 %330  ;;  %v348_v17 = vpop.permute.xlu0 %347 }
  0xb2   : > { %v353_v19 = vsel %vm352_vm0, %v351_v9, %v348_v17  ;;  %v356_v20 = vsel %vm352_vm0, %v348_v17, %v351_v9  ;;  %v452_v9 = vsub.s32 6, %v1344_v7 }
  0xb3   : > { %v365_v25 = vmul.f32 %v1353_v15, %v356_v20  ;;  %v366_v26 = vmul.f32 %v1356_v16, %v353_v19 }
  0xb4   : > { %v1432_v7 = vrot.slane %v1347_v11, %v452_v9 }
  0xb5   : > { %v388_v27 = vpop.permute.xlu1 %387  ;;  %v328_v30 = vpop.permute.xlu0 %327  ;;  %v502_v47 = vrot.slane %v365_v25, 4  ;;  %v503_v48 = vrot.slane %v366_v26, 4  ;;  %v1435_v25 = vrot.slane %v1349_v12, %v452_v9  ;;  %v840_v9 = vld [vmem:[%s1595_s6] sm:$0xf] }
  0xb6   : > { %v393_v31 = vsel %vm392_vm1, %v391_v8, %v388_v27  ;;  %v396_v32 = vsel %vm392_vm1, %v388_v27, %v391_v8  ;;  %v333_v33 = vsel %vm332_vm2, %v331_v14, %v328_v30  ;;  %v336_v34 = vsel %vm332_vm2, %v328_v30, %v331_v14 }
  0xb7   : > { %v405_v35 = vmul.f32 %v1362_v21, %v396_v32  ;;  %v406_v36 = vmul.f32 %v1365_v22, %v393_v31  ;;  %v345_v42 = vmul.f32 %v1372_v28, %v336_v34  ;;  %v346_v43 = vmul.f32 %v1375_v29, %v333_v33 }
  0xb8   : > { %v1421_v8 = vrot.slane %v1349_v12, %v472_v46  ;;  %v513_v32 = vcombine.high %v419_v18, %v419_v18 }
  0xb9   : > { %v371_v44 = vpop.permute.xlu1 %370  ;;  %v368_v45 = vpop.permute.xlu0 %367  ;;  %v508_v51 = vrot.slane %v405_v35, 4  ;;  %v509_v52 = vrot.slane %v406_v36, 4  ;;  %v529_v60 = vsel %vm527_vm4, %v346_v43, %v503_v48  ;;  %v528_v62 = vsel %vm527_vm4, %v345_v42, %v502_v47  ;;  %v1441_v42 = vld [vmem:[#allocation2 + $0x18] ss:$0 sm:$0xff] }
  0xba   : > { %v373_v49 = vsel %vm372_vm3, %v371_v44, %v368_v45  ;;  %v376_v50 = vsel %vm372_vm3, %v368_v45, %v371_v44 }
  0xbb   : > { %v385_v53 = vmul.f32 %v1384_v37, %v376_v50  ;;  %v386_v54 = vmul.f32 %v1387_v38, %v373_v49  ;;  %v1447_v49 = vld [vmem:[#allocation2 + $0x10] ss:$0 sm:$0xff] }
  0xbd   : > { %v423_v58 = vpop.permute.xlu1 %422  ;;  %v421_v59 = vpop.permute.xlu0 %420  ;;  %v531_v61 = vsel %vm527_vm4, %v386_v54, %v509_v52  ;;  %v530_v63 = vsel %vm527_vm4, %v385_v53, %v508_v51 }
  0xbe   : > { %v425_v2 = vsel %vm424_vm5, %v421_v59, %v423_v58  ;;  %v429_v3 = vsel %vm424_vm5, %v423_v58, %v421_v59  ;;  %v976_v4 = vpack.c.bf16 %v531_v61, %v529_v60  ;;  %v978_v5 = vpack.c.bf16 %v530_v63, %v528_v62 }
  0xbf   : > { %v438_v10 = vmul.f32 %v1404_v55, %v425_v2  ;;  %v439_v13 = vmul.f32 %v1407_v56, %v429_v3 }
  0xc0   : > { %977 = vmatprep.subr.bf16.mxu0 %v976_v4 }
  0xc1   : > { %v463_v14 = vpop.permute.xlu1 %462  ;;  %979 = vmatpush1.bf16.msra.mxu0 %v978_v5  ;;  %v461_v17 = vpop.permute.xlu0 %460  ;;  %v517_v26 = vrot.slane %v438_v10, 4  ;;  %v518_v27 = vrot.slane %v439_v13, 4  ;;  %v848_v10 = vld [vmem:[%s1596_s7] sm:$0xf] }
  0xc2   : > { %v465_v19 = vsel %vm464_vm6, %v461_v17, %v463_v14  ;;  %v469_v20 = vsel %vm464_vm6, %v463_v14, %v461_v17 }
  0xc3   : > { %v478_v23 = vmul.f32 %v1418_v6, %v465_v19  ;;  %v479_v24 = vmul.f32 %v1421_v8, %v469_v20  ;;  %v533_v43 = vsel %vm527_vm4, %v513_v32, %v518_v27  ;;  %v532_v46 = vsel %vm527_vm4, %v419_v18, %v517_v26 }
  0xc5   : > { %v443_v30 = vpop.permute.xlu1 %442  ;;  %v441_v31 = vpop.permute.xlu0 %440  ;;  %v523_v35 = vrot.slane %v478_v23, 4  ;;  %v524_v36 = vrot.slane %v479_v24, 4 }
  0xc6   : > { %v445_v33 = vsel %vm444_vm7, %v441_v31, %v443_v30  ;;  %v449_v34 = vsel %vm444_vm7, %v443_v30, %v441_v31 }
  0xc7   : > { %v458_v39 = vmul.f32 %v1432_v7, %v445_v33  ;;  %v459_v11 = vmul.f32 %v1435_v25, %v449_v34 }
  0xc9   : > { %v483_v12 = vpop.permute.xlu1 %482  ;;  %v535_v44 = vsel %vm527_vm4, %v459_v11, %v524_v36  ;;  %v481_v45 = vpop.permute.xlu0 %480  ;;  %v534_v47 = vsel %vm527_vm4, %v458_v39, %v523_v35 }
  0xca   : > { %v980_v48 = vpack.c.bf16 %v535_v44, %v533_v43  ;;  %v485_v50 = vsel %vm484_vm8, %v481_v45, %v483_v12  ;;  %v489_v51 = vsel %vm484_vm8, %v483_v12, %v481_v45  ;;  %v982_v52 = vpack.c.bf16 %v534_v47, %v532_v46 }
  0xcb   : > { %v499_v53 = vmul.f32 %v1441_v42, %v489_v51  ;;  %v498_v54 = vmul.f32 %v1447_v49, %v485_v50 }
  0xcc   : > { %981 = vmatprep.subr.bf16.mxu0 %v980_v48 }
  0xcd   : > { %983 = vmatpush1.bf16.msra.mxu0 %v982_v52 }
  0xce   : > { %963 = vmatprep.subr.msk.mxu0 %vm527_vm4, %v499_v53 }
  0xd1   : > { %964 = vmatpush1.msk.msra.mxu0 %vm527_vm4, %v498_v54 }
  0xd2   : > { %965 = vmatmul.mubr.msk.f32.vlgmr.msra.gmra.mrb[0].mxu0 %vm536_vm9, %v324_v57 }
  0xda   : > { %v621_v58 = vpop.permute.xlu0 %620  ;;  %v629_v60 = vpop.permute.xlu1 %628 }
 0x1a5   : > { %v612_v59 = vpop.f32.mrb[0].mxu0 }
 0x1a6   : > { %v623_v61 = vmul.f32 %v621_v58, %v612_v59  ;;  %v614_v62 = vpop.f32.mrb[1].mxu0 }
 0x1a7   : > { %v624_v2 = vmul.f32 %v621_v58, %v614_v62 }
 0x1a8   : > { %v631_v63 = vadd.f32 %v629_v60, %v623_v61 }
 0x1a9   : > { %v632_v4 = vadd.f32 %v629_v60, %v624_v2 }
 0x1aa   : > { %v1459_v3 = vmax.f32 %v631_v63, 0.0 }
 0x1ab   : > { %v634_v5 = vmax.f32 %v632_v4, 0.0 }
 0x1ac   : > { %684 = vrot.lane.b32.xlu1 %v1459_v3, %s1160_s13  ;;  %652 = vrot.lane.b32.xlu0 %v1459_v3, %s1157_s17  ;;  %v682_v61 = vmul.f32 %v1459_v3, %v1391_v40 }
 0x1ad   : > { %v683_v60 = vmul.f32 %v634_v5, %v1394_v41 }
 0x1b0   : > { %706 = vrot.lane.b32.xlu1 %v1459_v3, %s1161_s18  ;;  %674 = vrot.lane.b32.xlu0 %v1459_v3, %s1156_s19 }
 0x1b4   : > { %649 = vrot.lane.b32.xlu1 %v634_v5, %s1157_s17  ;;  %641 = vrot.lane.b32.xlu0 %v1459_v3, %s1158_s10 }
 0x1b8   : > { %671 = vrot.lane.b32.xlu1 %v634_v5, %s1156_s19  ;;  %663 = vrot.lane.b32.xlu0 %v1459_v3, %s1159_s12  ;;  %s1547_s19 = scalar_lea.hbm %s1597_s8, %s975_s24 }
 0x1bc   : > { %637 = vrot.lane.b32.xlu1 %v634_v5, %s1158_s10  ;;  %686 = vrot.lane.b32.xlu0 %v634_v5, %s1160_s13  ;;  %s1089_s13 = sshll.u32 %s1166_s9, 4  ;;  %s1090_s13 = int_to_ptr.vmem [resolvable:$false] %s1089_s13 }
 0x1c0   : > { %660 = vrot.lane.b32.xlu1 %v634_v5, %s1159_s12  ;;  %708 = vrot.lane.b32.xlu0 %v634_v5, %s1161_s18  ;;  %s1091_s12 = scalar_lea.vmem %s1090_s13, 256 }
 0x1c4   : > { %695 = vrot.lane.b32.xlu1 %v1459_v3, %s1163_s21  ;;  %697 = vrot.lane.b32.xlu0 %v634_v5, %s1163_s21  ;;  %s311_s21 = sand.u32 1, %s1143_s28  }
 0x1c5   : > { %s867_s17 = scalar_lea.sflag [#allocation4], %s311_s21 }
 0x1c8   : > { %717 = vrot.lane.b32.xlu1 %v1459_v3, %s1165_s22  ;;  %719 = vrot.lane.b32.xlu0 %v634_v5, %s1165_s22  ;;  %s958_s22 = sshll.u32 %s311_s21, 3 }
 0x1c9   : > { %s313_s25 = scalar_lea.vmem [#allocation5], %s958_s22 }
 0x1ca   : > { %s881_s20 = sshll.u32 %s313_s25, 4  ;;  %s1549_s20 = int_to_ptr.vmem [resolvable:$true] %s881_s20 }
 0x1cb   : > { %s1085_s10 = scalar_lea.vmem %s1549_s20, 128  ;;  %p1092_p2 = scmp.lt.s32.totalorder %s1549_s20, %s1090_s13 }
 0x1cc   : > { %843 = vperm.xlu1 %1055, %v840_v9   ;;  %851 = vperm.xlu0 %1054, %v848_v10   ;;  %p1086_p6 = scmp.ne.s32.totalorder %s1549_s20, %s1085_s10  ;;  %p1093_p3 = scmp.lt.s32.totalorder %s1091_s12, %s1085_s10 }
 0x1ce   : > { %p1087_p10 = pnand %p1086_p6, %p1608_p9  ;;  %p1094_p4 = por %p1093_p3, %p1092_p2 }
 0x1d0   : > { %p1088_p12 = pneg %p1087_p10 }
 0x1d2   : > { %p1095_p7 = pnand %p1094_p4, %p1088_p12 }
 0x21e   : > { %v685_v13 = vpop.permute.xlu1 %684  ;;  %v653_v14 = vpop.permute.xlu0 %652 }
 0x222   : > { %v707_v17 = vpop.permute.xlu1 %706  ;;  %v675_v18 = vpop.permute.xlu0 %674 }
 0x226   : > { %v650_v19 = vpop.permute.xlu1 %649  ;;  %v642_v20 = vpop.permute.xlu0 %641 }
 0x227   : > { %v654_v23 = vsel %vm352_vm0, %v653_v14, %v650_v19  ;;  %v657_v24 = vsel %vm352_vm0, %v650_v19, %v653_v14 }
 0x228   : > { %v658_v32 = vmul.f32 %v657_v24, %v1353_v15  ;;  %v659_v33 = vmul.f32 %v654_v23, %v1356_v16 }
 0x22a   : > { %v672_v26 = vpop.permute.xlu1 %671  ;;  %v664_v27 = vpop.permute.xlu0 %663  ;;  %v730_v45 = vrot.slane %v658_v32, 4  ;;  %v731_v46 = vrot.slane %v659_v33, 4 }
 0x22b   : > { %v676_v30 = vsel %vm392_vm1, %v675_v18, %v672_v26  ;;  %v679_v31 = vsel %vm392_vm1, %v672_v26, %v675_v18 }
 0x22c   : > { %v680_v34 = vmul.f32 %v679_v31, %v1362_v21  ;;  %v681_v35 = vmul.f32 %v676_v30, %v1365_v22  ;;  %v635_v30 = vld [vmem:[%s1592_s3] sm:$0xf] }
 0x22e   : > { %v638_v36 = vpop.permute.xlu1 %637  ;;  %v687_v39 = vpop.permute.xlu0 %686  ;;  %v736_v47 = vrot.slane %v680_v34, 4  ;;  %v737_v21 = vrot.slane %v681_v35, 4 }
 0x22f   : > { %v643_v11 = vsel %vm332_vm2, %v642_v20, %v638_v36  ;;  %v646_v12 = vsel %vm332_vm2, %v638_v36, %v642_v20  ;;  %v688_v43 = vsel %vm424_vm5, %v685_v13, %v687_v39  ;;  %v692_v44 = vsel %vm424_vm5, %v687_v39, %v685_v13 }
 0x230   : > { %v693_v15 = vmul.f32 %v688_v43, %v1404_v55  ;;  %v694_v16 = vmul.f32 %v692_v44, %v1407_v56  ;;  %v647_v22 = vmul.f32 %v646_v12, %v1372_v28  ;;  %v648_v48 = vmul.f32 %v643_v11, %v1375_v29 }
 0x232   : > { %v661_v50 = vpop.permute.xlu1 %660  ;;  %v709_v51 = vpop.permute.xlu0 %708  ;;  %v742_v59 = vrot.slane %v693_v15, 4  ;;  %v743_v29 = vrot.slane %v694_v16, 4  ;;  %v753_v2 = vsel %vm527_vm4, %v648_v48, %v731_v46 }
 0x233   : > { %v665_v52 = vsel %vm372_vm3, %v664_v27, %v661_v50  ;;  %v668_v53 = vsel %vm372_vm3, %v661_v50, %v664_v27  ;;  %v710_v54 = vsel %vm464_vm6, %v707_v17, %v709_v51  ;;  %v714_v57 = vsel %vm464_vm6, %v709_v51, %v707_v17 }
 0x234   : > { %v669_v55 = vmul.f32 %v668_v53, %v1384_v37  ;;  %v670_v56 = vmul.f32 %v665_v52, %v1387_v38  ;;  %v715_v58 = vmul.f32 %v710_v54, %v1418_v6  ;;  %v716_v28 = vmul.f32 %v714_v57, %v1421_v8 }
 0x235   : > { %v752_v37 = vsel %vm527_vm4, %v647_v22, %v730_v45  ;;  %v757_v17 = vsel %vm527_vm4, %v683_v60, %v743_v29  ;;  %v756_v19 = vsel %vm527_vm4, %v682_v61, %v742_v59 }
 0x236   : > { %v696_v62 = vpop.permute.xlu1 %695  ;;  %v698_v63 = vpop.permute.xlu0 %697  ;;  %v755_v4 = vsel %vm527_vm4, %v670_v56, %v737_v21  ;;  %v754_v38 = vsel %vm527_vm4, %v669_v55, %v736_v47  ;;  %v748_v41 = vrot.slane %v715_v58, 4  ;;  %v749_v5 = vrot.slane %v716_v28, 4 }
 0x237   : > { %v699_v6 = vsel %vm444_vm7, %v696_v62, %v698_v63  ;;  %v703_v8 = vsel %vm444_vm7, %v698_v63, %v696_v62  ;;  %v984_v9 = vpack.c.bf16 %v755_v4, %v753_v2  ;;  %v986_v10 = vpack.c.bf16 %v754_v38, %v752_v37 }
 0x238   : > { %v704_v40 = vmul.f32 %v699_v6, %v1432_v7  ;;  %v705_v3 = vmul.f32 %v703_v8, %v1435_v25 }
 0x239   : > { %985 = vmatprep.subr.bf16.mxu1 %v984_v9 }
 0x23a   : > { %v718_v13 = vpop.permute.xlu1 %717  ;;  %987 = vmatpush1.bf16.msra.mxu1 %v986_v10  ;;  %v720_v14 = vpop.permute.xlu0 %719  ;;  %v759_v18 = vsel %vm527_vm4, %v705_v3, %v749_v5  ;;  %v758_v20 = vsel %vm527_vm4, %v704_v40, %v748_v41 }
 0x23b   : > { %v725_v23 = vsel %vm484_vm8, %v720_v14, %v718_v13  ;;  %v988_v24 = vpack.c.bf16 %v759_v18, %v757_v17  ;;  %v990_v26 = vpack.c.bf16 %v758_v20, %v756_v19  ;;  %v721_v25 = vsel %vm484_vm8, %v718_v13, %v720_v14 }
 0x23c   : > { %v727_v7 = vmul.f32 %v1441_v42, %v725_v23  ;;  %v726_v27 = vmul.f32 %v1447_v49, %v721_v25 }
 0x23d   : > { %989 = vmatprep.subr.bf16.mxu1 %v988_v24 }
 0x23e   : > { %991 = vmatpush1.bf16.msra.mxu1 %v990_v26 }
 0x23f   : > { %966 = vmatprep.subr.msk.mxu1 %vm527_vm4, %v727_v7 }
 0x242   : > { %967 = vmatpush1.msk.msra.mxu1 %vm527_vm4, %v726_v27 }
 0x243   : > { %968 = vmatmul.mubr.msk.f32.vlgmr.msra.gmra.mrb[0].mxu1 %vm536_vm9, %v635_v30 }
 0x24b   : > { %v844_v31 = vpop.permute.xlu1 %843  ;;  %v852_v34 = vpop.permute.xlu0 %851 }
 0x316   : > { %v835_v42 = vpop.f32.mrb[0].mxu1 }
 0x317   : > { %v846_v32 = vmul.f32 %v844_v31, %v835_v42  ;;  %v837_v33 = vpop.f32.mrb[1].mxu1 }
 0x318   : > { %v847_v35 = vmul.f32 %v844_v31, %v837_v33 }
 0x319   : > { %v854_v36 = vadd.f32 %v852_v34, %v846_v32 }
 0x31a   : > { %v855_v49 = vadd.f32 %v852_v34, %v847_v35 }
 0x31b   : > { %v857_v39 = vadd.f32 %v854_v36, %v1300_v0 }
 0x31c   : > { %v858_v11 = vadd.f32 %v855_v49, %v1308_v1 }
 0x31d   : > { %v859_v12 = vmax.f32 %v857_v39, 0.0 }
 0x31e   : > { %v860_v43 = vmax.f32 %v858_v11, 0.0 }
 0x320   : > { %v863_v44 = vcombine.low %v859_v12, %v860_v43 }
 0x322   : > { %865 = vst [vmem:[%s313_s25] sm:$0xff] %v863_v44 }
 0x323   : > { %1098 = shalt.err (!%p1095_p7)
}
 0x324   : > { %s1099_s18 = scalar_lea.hbm %s1547_s19, 128  ;;  %s1103_s24 = scalar_lea.hbm %s1597_s8, 256 }
 0x325   : > { %p1100_p8 = scmp.ne.s32.totalorder %s1547_s19, %s1099_s18  ;;  %p1104_p1 = scmp.lt.u32.totalorder %s1547_s19, %s1597_s8 }
 0x326   : > { %p1105_p0 = scmp.lt.u32.totalorder %s1103_s24, %s1099_s18  ;;  %p1107_p6 = scmp.lt.u32.totalorder %s1099_s18, %s1547_s19 }
 0x327   : > { %p1101_p11 = pnand %p1100_p8, %p1608_p9 }
 0x328   : > { %p1106_p5 = por %p1105_p0, %p1104_p1 }
 0x329   : > { %p1102_p13 = pneg %p1101_p11 }
 0x32a   : > { %p1108_p10 = por %p1107_p6, %p1106_p5 }
 0x32c   : > { %p1109_p12 = pnand %p1108_p10, %p1102_p13 }
 0x32e   : > { %1112 = shalt.err (!%p1109_p12)
}
 0x32f   : > { %996 = dma.vmem_to_hbm [thread:$0]  (%p1608_p9), %s1549_s20, 128, %s1547_s19, %s867_s17  }
 0x330 PF: > { %p1008_p2 = scmp.ge.s32.totalorder %s1151_s30, 2  ;;  %s893_s23 = sand.u32 1, %s1139_s27  }
 0x331   : > { %p1609_p3 = scmp.ne.s32.totalorder %s1602_s16, 0  ;;  %s894_s10 = scalar_lea.sflag [#allocation4], %s893_s23 }
 0x333   : > { %p1003_p4 = pnand %p1008_p2, %p1609_p3 }
 0x335   : > { %1134 = dma.done.wait (!%p1003_p4), %s894_s10, 128  }
 0x336   : > { %1136 = vsyncadd (!%p1003_p4), %s894_s10, 4294967168  ;;  %p19_p7 = scmp.ge.s32.totalorder %s1237_s11, 4   ;;  %s1610_s27 = smov %s1143_s28 }
 0x337   : > { %s1611_s28 = smov %s1147_s29  ;;  %s1612_s29 = smov %s1248_s14 }
 0x338   : > { %s1613_s30 = smov %s1237_s11  ;;  %21 = sbr.rel (!%p19_p7) target bundleno = 4 (0x4), region = 92 }
 0x33f   :  { %899 = vsyncpa [#allocation3], 1 }
 0x340   :  { %901 = vsyncpa [#allocation3 + $0x1], 1 }
 0x341   :  { %902 = vsyncpa [#allocation4], 1 }
 0x342   :  { %904 = vsyncpa [#allocation4 + $0x1], 1 }

</bundles_post_ra>
